<compile_context>
chip_gen: v5e
topology: v5e:2x2
jax: 0.10.0
libtpu: 0.0.40
codegen_flags: <defaults>
</compile_context>

<pallas_src>
import jax
import jax.numpy as jnp
import numpy as np
from jax.experimental import pallas as pl
from jax.experimental.pallas import tpu as pltpu


EMB_DIM = 32      # p
NODE_DIM = 5
T_ITERS = 4
N_EXTRA_1 = 1     # nr_extra_layers_1 (hard-wired to 1, as in the PyTorch module)


def _qnet_kernel(xv_ref, ws_ref, w1_ref, wslab_ref, vecs_ref, b5_ref, out_ref):
    """Processes TB batch elements per grid step.

    xv_ref   : (TB, N, 5)
    ws_ref   : (TB, N, N)
    w1_ref   : (5, p)                       theta1
    wslab_ref: (p, 5p)  = [w1e | w2 | w3 | w6 | w7] along the output axis
    vecs_ref : (10, p)  = [b1, b1e, b2, b3, w4, b4, b6, b7, w5_g, w5_l]
    b5_ref   : (1, 1)
    out_ref  : (1, TB, N)
    """
    tb, n, nd = xv_ref.shape
    p = w1_ref.shape[1]

    x = xv_ref[...]                       # (TB, N, 5)
    W = ws_ref[...]                       # (TB, N, N)

    # --- packed parameters (static slices) ---
    w1 = w1_ref[...]                      # (5, p)
    w1e = wslab_ref[:, 0 * p:1 * p]       # (p, p)
    w2 = wslab_ref[:, 1 * p:2 * p]
    w3 = wslab_ref[:, 2 * p:3 * p]
    w67 = wslab_ref[:, 3 * p:5 * p]       # (p, 2p)  fused theta6 | theta7

    vecs = vecs_ref[...]                  # (10, p)
    b1, b1e, b2, b3 = vecs[0], vecs[1], vecs[2], vecs[3]
    w4v, b4v = vecs[4], vecs[5]
    b6, b7 = vecs[6], vecs[7]
    w5g, w5l = vecs[8], vecs[9]

    conn = jnp.where(W > 0, jnp.ones_like(W), jnp.zeros_like(W))   # (TB, N, N)

    # --- s1 = theta1_extra(relu(theta1(xv))), batch flattened into M ---
    xf = x.reshape(tb * n, nd)                                      # (TB*N, 5)
    s1 = jnp.dot(xf, w1, preferred_element_type=jnp.float32) + b1
    s1 = jnp.maximum(s1, 0.0)
    s1 = jnp.dot(s1, w1e, preferred_element_type=jnp.float32) + b1e  # (TB*N, p)

    # --- s3 = theta3( sum_i relu(theta4(Ws[:, i, :])) ), chunked over i ---
    chunk = min(n, 128)
    s3_2 = jnp.zeros((tb, n, p), dtype=jnp.float32)
    for c0 in range(0, n, chunk):
        c1 = min(c0 + chunk, n)
        wc = W[:, c0:c1, :]                                         # (TB, C, N)
        t = jnp.maximum(wc[..., None] * w4v + b4v, 0.0)             # (TB, C, N, p)
        s3_2 = s3_2 + jnp.sum(t, axis=1)                            # (TB, N, p)
    s3 = (jnp.dot(s3_2.reshape(tb * n, p), w3,
                  preferred_element_type=jnp.float32) + b3)         # (TB*N, p)

    # --- message passing (first iteration folded: mu=0 -> s2 = b2) ---
    mu = jnp.maximum(s1 + s3 + b2, 0.0)                             # (TB*N, p)
    for _ in range(T_ITERS - 1):
        agg = jnp.einsum('bij,bjk->bik', conn, mu.reshape(tb, n, p),
                         preferred_element_type=jnp.float32)        # (TB, N, p)
        s2 = (jnp.dot(agg.reshape(tb * n, p), w2,
                      preferred_element_type=jnp.float32) + b2)     # (TB*N, p)
        mu = jnp.maximum(s1 + s2 + s3, 0.0)

    # --- fused readout: Y = mu @ [w6 | w7] ---
    Y = jnp.dot(mu, w67, preferred_element_type=jnp.float32)        # (TB*N, 2p)
    yg = Y[:, :p].reshape(tb, n, p)                                 # mu @ w6 per node
    yl = Y[:, p:].reshape(tb, n, p)                                 # mu @ w7 per node
    g = jnp.sum(yg, axis=1) + b6                                    # (TB, p)   theta6(sum mu)
    l = yl + b7                                                     # (TB, N, p) theta7(mu)

    # theta5 on relu(cat[global, local]) == relu(g)@w5[:p] + relu(l)@w5[p:] + b5
    qg = jnp.sum(jnp.maximum(g, 0.0) * w5g, axis=-1, keepdims=True)  # (TB, 1)
    ql = jnp.sum(jnp.maximum(l, 0.0) * w5l, axis=-1)                 # (TB, N)
    out_ref[0] = (qg + ql + b5_ref[...]).astype(out_ref.dtype)       # lane-dense (TB, N)


def init_params(key, emb_dim=EMB_DIM):
    """Deterministic synthetic parameters. Weights are (in, out); biases are (1, out)."""
    p = emb_dim
    shapes = {
        "w1": (NODE_DIM, p), "b1": (1, p),
        "w1e": (p, p),       "b1e": (1, p),
        "w2": (p, p),        "b2": (1, p),
        "w3": (p, p),        "b3": (1, p),
        "w4": (1, p),        "b4": (1, p),
        "w5": (2 * p, 1),    "b5": (1, 1),
        "w6": (p, p),        "b6": (1, p),
        "w7": (p, p),        "b7": (1, p),
    }
    params = {}
    keys = jax.random.split(key, len(shapes))
    for k, (name, shape) in zip(keys, sorted(shapes.items())):
        params[name] = 0.1 * jax.random.normal(k, shape, dtype=jnp.float32)
    return params


def _pick_tb(B, N):
    """Largest batch block that (a) divides B, (b) leaves >= 2 grid steps when
    B >= 2 (both TensorCores get work on v7x), (c) keeps the double-buffered
    Ws block comfortably inside VMEM."""
    budget_bytes = 8 * 1024 * 1024
    best = 1
    for cand in range(1, B + 1):
        if B % cand:
            continue
        if B >= 2 and (B // cand) < 2:
            continue
        if 2 * cand * N * N * 4 > budget_bytes:
            continue
        best = cand
    return best


@jax.jit
def qnet_forward(xv, Ws, params):
    B, N, _ = xv.shape
    p = params["w1"].shape[1]
    TB = _pick_tb(B, N)

    # --- pack the 16 small parameter tensors into 3 slabs + a scalar ---
    wslab = jnp.concatenate(
        [params["w1e"], params["w2"], params["w3"], params["w6"], params["w7"]],
        axis=1)                                                      # (p, 5p)
    vecs = jnp.stack(
        [params["b1"][0], params["b1e"][0], params["b2"][0], params["b3"][0],
         params["w4"][0], params["b4"][0], params["b6"][0], params["b7"][0],
         params["w5"][:p, 0], params["w5"][p:, 0]], axis=0)          # (10, p)
    b5 = params["b5"]                                                # (1, 1)

    def batch_map(b):
        return (b, 0, 0)

    def const2d(b):
        return (0, 0)

    grid_spec = pltpu.PrefetchScalarGridSpec(
        num_scalar_prefetch=0,
        grid=(B // TB,),
        in_specs=[
            pl.BlockSpec((TB, N, NODE_DIM), batch_map),   # xv
            pl.BlockSpec((TB, N, N), batch_map),          # Ws
            pl.BlockSpec(params["w1"].shape, const2d),    # w1
            pl.BlockSpec(wslab.shape, const2d),           # packed (p,p) weights
            pl.BlockSpec(vecs.shape, const2d),            # packed p-vectors
            pl.BlockSpec(b5.shape, const2d),              # b5
        ],
        # lane-dense output: (grid_step, TB, N); reshaped to (B, N) below.
        out_specs=pl.BlockSpec((1, TB, N), lambda b: (b, 0, 0)),
    )

    out = pl.pallas_call(
        _qnet_kernel,
        out_shape=jax.ShapeDtypeStruct((B // TB, TB, N), jnp.float32),
        grid_spec=grid_spec,
        compiler_params=pltpu.CompilerParams(
            dimension_semantics=("parallel",),
            vmem_limit_bytes=48 * 1024 * 1024),
    )(xv, Ws, params["w1"], wslab, vecs, b5)
    return out.reshape(B, N)   # matches .squeeze(dim=2)


def qnet_reference(xv, Ws, params):
    """Pure-JAX reference mirroring the PyTorch forward exactly."""
    conn = jnp.where(Ws > 0, jnp.ones_like(Ws), jnp.zeros_like(Ws))
    B, N, _ = xv.shape
    p = params["w1"].shape[1]
    lin = lambda x, w, b: x @ w + b[0]

    s1 = lin(xv, params["w1"], params["b1"])
    s1 = lin(jax.nn.relu(s1), params["w1e"], params["b1e"])
    s3_1 = jax.nn.relu(Ws[..., None] * params["w4"][0] + params["b4"][0])   # (B, N, N, p)
    s3_2 = jnp.sum(s3_1, axis=1)
    s3 = lin(s3_2, params["w3"], params["b3"])
    mu = jnp.zeros((B, N, p), dtype=jnp.float32)
    for _ in range(T_ITERS):
        s2 = lin(conn @ mu, params["w2"], params["b2"])
        mu = jax.nn.relu(s1 + s2 + s3)
    gs = lin(jnp.sum(mu, axis=1, keepdims=True), params["w6"], params["b6"])
    gs = jnp.broadcast_to(gs, (B, N, p))
    la = lin(mu, params["w7"], params["b7"])
    out = jax.nn.relu(jnp.concatenate([gs, la], axis=2))
    return (lin(out, params["w5"], params["b5"]))[..., 0]


if __name__ == "__main__":
    key = jax.random.PRNGKey(0)
    k_params, k_xv, k_w = jax.random.split(key, 3)

    B, N = 4, 8                     # small demo shapes; TB=2 -> 2 grid steps
    params = init_params(k_params, EMB_DIM)

    xv = jax.random.uniform(k_xv, (B, N, NODE_DIM), dtype=jnp.float32)
    # adjacency-like weights with some zeros so conn_matrices is nontrivial
    raw = jax.random.uniform(k_w, (B, N, N), dtype=jnp.float32)
    Ws = jnp.where(raw > 0.4, raw, 0.0)

    out = qnet_forward(xv, Ws, params)
    out = jax.block_until_ready(out)

    ref = qnet_reference(xv, Ws, params)
    assert out.shape == (B, N)
    np.testing.assert_allclose(np.asarray(out), np.asarray(ref), rtol=1e-4, atol=1e-4)

    print("KERNEL_OK")
</pallas_src>

<mosaic_0001>
module attributes {stable_mosaic.version = 11 : i64} {
  func.func @_qnet_kernel(%arg0: i32, %arg1: memref<2x8x5xf32, #tpu.memory_space<vmem>>, %arg2: memref<2x8x8xf32, #tpu.memory_space<vmem>>, %arg3: memref<5x32xf32, #tpu.memory_space<vmem>>, %arg4: memref<32x160xf32, #tpu.memory_space<vmem>>, %arg5: memref<10x32xf32, #tpu.memory_space<vmem>>, %arg6: memref<1x1xf32, #tpu.memory_space<vmem>>, %arg7: memref<1x2x8xf32, #tpu.memory_space<vmem>>) attributes {dimension_semantics = [#tpu.dimension_semantics<parallel>], iteration_bounds = array<i64: 2>, scalar_prefetch = 0 : i64, scratch_operands = 0 : i64, tpu.core_type = #tpu.core_type<tc>, window_params = [{transform_indices = @transform_0, window_bounds = array<i64: 2, 8, 5>}, {transform_indices = @transform_1, window_bounds = array<i64: 2, 8, 8>}, {pipeline_mode = #tpu.pipeline_mode<synchronous>, transform_indices = @transform_2, window_bounds = array<i64: 5, 32>}, {pipeline_mode = #tpu.pipeline_mode<synchronous>, transform_indices = @transform_3, window_bounds = array<i64: 32, 160>}, {pipeline_mode = #tpu.pipeline_mode<synchronous>, transform_indices = @transform_4, window_bounds = array<i64: 10, 32>}, {pipeline_mode = #tpu.pipeline_mode<synchronous>, transform_indices = @transform_5, window_bounds = array<i64: 1, 1>}, {transform_indices = @transform_6, window_bounds = array<i64: 1, 2, 8>}]} {
    %c0 = arith.constant 0 : index
    %c0_0 = arith.constant 0 : index
    %c0_1 = arith.constant 0 : index
    %0 = vector.load %arg1[%c0, %c0_0, %c0_1] : memref<2x8x5xf32, #tpu.memory_space<vmem>>, vector<2x8x5xf32>
    %c0_2 = arith.constant 0 : index
    %c0_3 = arith.constant 0 : index
    %c0_4 = arith.constant 0 : index
    %1 = vector.load %arg2[%c0_2, %c0_3, %c0_4] : memref<2x8x8xf32, #tpu.memory_space<vmem>>, vector<2x8x8xf32>
    %c0_5 = arith.constant 0 : index
    %c0_6 = arith.constant 0 : index
    %2 = vector.load %arg3[%c0_5, %c0_6] : memref<5x32xf32, #tpu.memory_space<vmem>>, vector<5x32xf32>
    %c0_7 = arith.constant 0 : index
    %c0_8 = arith.constant 0 : index
    %3 = vector.load %arg4[%c0_7, %c0_8] : memref<32x160xf32, #tpu.memory_space<vmem>>, vector<32x32xf32>
    %c0_9 = arith.constant 0 : index
    %c32 = arith.constant 32 : index
    %4 = vector.load %arg4[%c0_9, %c32] : memref<32x160xf32, #tpu.memory_space<vmem>>, vector<32x32xf32>
    %c0_10 = arith.constant 0 : index
    %c64 = arith.constant 64 : index
    %5 = vector.load %arg4[%c0_10, %c64] : memref<32x160xf32, #tpu.memory_space<vmem>>, vector<32x32xf32>
    %c0_11 = arith.constant 0 : index
    %c96 = arith.constant 96 : index
    %6 = vector.load %arg4[%c0_11, %c96] : memref<32x160xf32, #tpu.memory_space<vmem>>, vector<32x64xf32>
    %c0_12 = arith.constant 0 : index
    %c0_13 = arith.constant 0 : index
    %7 = vector.load %arg5[%c0_12, %c0_13] : memref<10x32xf32, #tpu.memory_space<vmem>>, vector<10x32xf32>
    %8 = vector.extract_strided_slice %7 {offsets = [0, 0], sizes = [1, 32], strides = [1, 1]} : vector<10x32xf32> to vector<1x32xf32>
    %9 = vector.shape_cast %8 : vector<1x32xf32> to vector<32xf32>
    %10 = vector.extract_strided_slice %7 {offsets = [1, 0], sizes = [1, 32], strides = [1, 1]} : vector<10x32xf32> to vector<1x32xf32>
    %11 = vector.shape_cast %10 : vector<1x32xf32> to vector<32xf32>
    %12 = vector.extract_strided_slice %7 {offsets = [2, 0], sizes = [1, 32], strides = [1, 1]} : vector<10x32xf32> to vector<1x32xf32>
    %13 = vector.shape_cast %12 : vector<1x32xf32> to vector<32xf32>
    %14 = vector.extract_strided_slice %7 {offsets = [3, 0], sizes = [1, 32], strides = [1, 1]} : vector<10x32xf32> to vector<1x32xf32>
    %15 = vector.shape_cast %14 : vector<1x32xf32> to vector<32xf32>
    %16 = vector.extract_strided_slice %7 {offsets = [4, 0], sizes = [1, 32], strides = [1, 1]} : vector<10x32xf32> to vector<1x32xf32>
    %17 = vector.shape_cast %16 : vector<1x32xf32> to vector<32xf32>
    %18 = vector.extract_strided_slice %7 {offsets = [5, 0], sizes = [1, 32], strides = [1, 1]} : vector<10x32xf32> to vector<1x32xf32>
    %19 = vector.shape_cast %18 : vector<1x32xf32> to vector<32xf32>
    %20 = vector.extract_strided_slice %7 {offsets = [6, 0], sizes = [1, 32], strides = [1, 1]} : vector<10x32xf32> to vector<1x32xf32>
    %21 = vector.shape_cast %20 : vector<1x32xf32> to vector<32xf32>
    %22 = vector.extract_strided_slice %7 {offsets = [7, 0], sizes = [1, 32], strides = [1, 1]} : vector<10x32xf32> to vector<1x32xf32>
    %23 = vector.shape_cast %22 : vector<1x32xf32> to vector<32xf32>
    %24 = vector.extract_strided_slice %7 {offsets = [8, 0], sizes = [1, 32], strides = [1, 1]} : vector<10x32xf32> to vector<1x32xf32>
    %25 = vector.shape_cast %24 : vector<1x32xf32> to vector<32xf32>
    %26 = vector.extract_strided_slice %7 {offsets = [9, 0], sizes = [1, 32], strides = [1, 1]} : vector<10x32xf32> to vector<1x32xf32>
    %27 = vector.shape_cast %26 : vector<1x32xf32> to vector<32xf32>
    %cst = arith.constant 0.000000e+00 : f32
    %28 = vector.broadcast %cst : f32 to vector<2x8x8xf32>
    %29 = arith.cmpf ogt, %1, %28 : vector<2x8x8xf32>
    %cst_14 = arith.constant 1.000000e+00 : f32
    %30 = vector.broadcast %cst_14 : f32 to vector<2x8x8xf32>
    %cst_15 = arith.constant 0.000000e+00 : f32
    %31 = vector.broadcast %cst_15 : f32 to vector<2x8x8xf32>
    %32 = arith.select %29, %30, %31 : vector<2x8x8xi1>, vector<2x8x8xf32>
    %33 = vector.shape_cast %0 : vector<2x8x5xf32> to vector<16x5xf32>
    %cst_16 = arith.constant dense<0.000000e+00> : vector<16x32xf32>
    %34 = tpu.matmul %33, %2, %cst_16 {dimension_numbers = #tpu.dot_dimension_numbers<[1], [0], [0], [1], [0, 0, 1, 1], [], []>} : vector<16x5xf32>, vector<5x32xf32>, vector<16x32xf32> -> vector<16x32xf32>
    %35 = vector.shape_cast %9 : vector<32xf32> to vector<1x32xf32>
    %36 = vector.broadcast %35 : vector<1x32xf32> to vector<16x32xf32>
    %37 = arith.addf %34, %36 : vector<16x32xf32>
    %cst_17 = arith.constant 0.000000e+00 : f32
    %38 = vector.broadcast %cst_17 : f32 to vector<16x32xf32>
    %39 = arith.maximumf %37, %38 : vector<16x32xf32>
    %cst_18 = arith.constant dense<0.000000e+00> : vector<16x32xf32>
    %40 = tpu.matmul %39, %3, %cst_18 {dimension_numbers = #tpu.dot_dimension_numbers<[1], [0], [0], [1], [0, 0, 1, 1], [], []>} : vector<16x32xf32>, vector<32x32xf32>, vector<16x32xf32> -> vector<16x32xf32>
    %41 = vector.shape_cast %11 : vector<32xf32> to vector<1x32xf32>
    %42 = vector.broadcast %41 : vector<1x32xf32> to vector<16x32xf32>
    %43 = arith.addf %40, %42 : vector<16x32xf32>
    %cst_19 = arith.constant 0.000000e+00 : f32
    %44 = vector.broadcast %cst_19 : f32 to vector<2x8x32xf32>
    %45 = vector.shape_cast %1 : vector<2x8x8xf32> to vector<2x8x8x1xf32>
    %46 = vector.shape_cast %17 : vector<32xf32> to vector<1x1x1x32xf32>
    %47 = vector.broadcast %45 : vector<2x8x8x1xf32> to vector<2x8x8x32xf32>
    %48 = vector.broadcast %46 : vector<1x1x1x32xf32> to vector<2x8x8x32xf32>
    %49 = arith.mulf %47, %48 : vector<2x8x8x32xf32>
    %50 = vector.shape_cast %19 : vector<32xf32> to vector<1x1x1x32xf32>
    %51 = vector.broadcast %50 : vector<1x1x1x32xf32> to vector<2x8x8x32xf32>
    %52 = arith.addf %49, %51 : vector<2x8x8x32xf32>
    %cst_20 = arith.constant 0.000000e+00 : f32
    %53 = vector.broadcast %cst_20 : f32 to vector<2x8x8x32xf32>
    %54 = arith.maximumf %52, %53 : vector<2x8x8x32xf32>
    %cst_21 = arith.constant dense<0.000000e+00> : vector<2x8x32xf32>
    %55 = vector.multi_reduction <add>, %54, %cst_21 [1] : vector<2x8x8x32xf32> to vector<2x8x32xf32>
    %56 = arith.addf %44, %55 : vector<2x8x32xf32>
    %57 = vector.shape_cast %56 : vector<2x8x32xf32> to vector<16x32xf32>
    %cst_22 = arith.constant dense<0.000000e+00> : vector<16x32xf32>
    %58 = tpu.matmul %57, %5, %cst_22 {dimension_numbers = #tpu.dot_dimension_numbers<[1], [0], [0], [1], [0, 0, 1, 1], [], []>} : vector<16x32xf32>, vector<32x32xf32>, vector<16x32xf32> -> vector<16x32xf32>
    %59 = vector.shape_cast %15 : vector<32xf32> to vector<1x32xf32>
    %60 = vector.broadcast %59 : vector<1x32xf32> to vector<16x32xf32>
    %61 = arith.addf %58, %60 : vector<16x32xf32>
    %62 = arith.addf %43, %61 : vector<16x32xf32>
    %63 = vector.shape_cast %13 : vector<32xf32> to vector<1x32xf32>
    %64 = vector.broadcast %63 : vector<1x32xf32> to vector<16x32xf32>
    %65 = arith.addf %62, %64 : vector<16x32xf32>
    %cst_23 = arith.constant 0.000000e+00 : f32
    %66 = vector.broadcast %cst_23 : f32 to vector<16x32xf32>
    %67 = arith.maximumf %65, %66 : vector<16x32xf32>
    %68 = vector.shape_cast %67 : vector<16x32xf32> to vector<2x8x32xf32>
    "tpu.trace_start"() <{level = 10 : i32, message = "bij,bjk->bik"}> : () -> ()
    %cst_24 = arith.constant dense<0.000000e+00> : vector<2x8x32xf32>
    %69 = tpu.matmul %32, %68, %cst_24 {dimension_numbers = #tpu.dot_dimension_numbers<[2], [1], [1], [2], [0, 0, 0, 1, 1, 2], [0], [0]>} : vector<2x8x8xf32>, vector<2x8x32xf32>, vector<2x8x32xf32> -> vector<2x8x32xf32>
    "tpu.trace_stop"() : () -> ()
    %70 = vector.shape_cast %69 : vector<2x8x32xf32> to vector<16x32xf32>
    %cst_25 = arith.constant dense<0.000000e+00> : vector<16x32xf32>
    %71 = tpu.matmul %70, %4, %cst_25 {dimension_numbers = #tpu.dot_dimension_numbers<[1], [0], [0], [1], [0, 0, 1, 1], [], []>} : vector<16x32xf32>, vector<32x32xf32>, vector<16x32xf32> -> vector<16x32xf32>
    %72 = vector.shape_cast %13 : vector<32xf32> to vector<1x32xf32>
    %73 = vector.broadcast %72 : vector<1x32xf32> to vector<16x32xf32>
    %74 = arith.addf %71, %73 : vector<16x32xf32>
    %75 = arith.addf %43, %74 : vector<16x32xf32>
    %76 = arith.addf %75, %61 : vector<16x32xf32>
    %cst_26 = arith.constant 0.000000e+00 : f32
    %77 = vector.broadcast %cst_26 : f32 to vector<16x32xf32>
    %78 = arith.maximumf %76, %77 : vector<16x32xf32>
    %79 = vector.shape_cast %78 : vector<16x32xf32> to vector<2x8x32xf32>
    "tpu.trace_start"() <{level = 10 : i32, message = "bij,bjk->bik"}> : () -> ()
    %cst_27 = arith.constant dense<0.000000e+00> : vector<2x8x32xf32>
    %80 = tpu.matmul %32, %79, %cst_27 {dimension_numbers = #tpu.dot_dimension_numbers<[2], [1], [1], [2], [0, 0, 0, 1, 1, 2], [0], [0]>} : vector<2x8x8xf32>, vector<2x8x32xf32>, vector<2x8x32xf32> -> vector<2x8x32xf32>
    "tpu.trace_stop"() : () -> ()
    %81 = vector.shape_cast %80 : vector<2x8x32xf32> to vector<16x32xf32>
    %cst_28 = arith.constant dense<0.000000e+00> : vector<16x32xf32>
    %82 = tpu.matmul %81, %4, %cst_28 {dimension_numbers = #tpu.dot_dimension_numbers<[1], [0], [0], [1], [0, 0, 1, 1], [], []>} : vector<16x32xf32>, vector<32x32xf32>, vector<16x32xf32> -> vector<16x32xf32>
    %83 = vector.shape_cast %13 : vector<32xf32> to vector<1x32xf32>
    %84 = vector.broadcast %83 : vector<1x32xf32> to vector<16x32xf32>
    %85 = arith.addf %82, %84 : vector<16x32xf32>
    %86 = arith.addf %43, %85 : vector<16x32xf32>
    %87 = arith.addf %86, %61 : vector<16x32xf32>
    %cst_29 = arith.constant 0.000000e+00 : f32
    %88 = vector.broadcast %cst_29 : f32 to vector<16x32xf32>
    %89 = arith.maximumf %87, %88 : vector<16x32xf32>
    %90 = vector.shape_cast %89 : vector<16x32xf32> to vector<2x8x32xf32>
    "tpu.trace_start"() <{level = 10 : i32, message = "bij,bjk->bik"}> : () -> ()
    %cst_30 = arith.constant dense<0.000000e+00> : vector<2x8x32xf32>
    %91 = tpu.matmul %32, %90, %cst_30 {dimension_numbers = #tpu.dot_dimension_numbers<[2], [1], [1], [2], [0, 0, 0, 1, 1, 2], [0], [0]>} : vector<2x8x8xf32>, vector<2x8x32xf32>, vector<2x8x32xf32> -> vector<2x8x32xf32>
    "tpu.trace_stop"() : () -> ()
    %92 = vector.shape_cast %91 : vector<2x8x32xf32> to vector<16x32xf32>
    %cst_31 = arith.constant dense<0.000000e+00> : vector<16x32xf32>
    %93 = tpu.matmul %92, %4, %cst_31 {dimension_numbers = #tpu.dot_dimension_numbers<[1], [0], [0], [1], [0, 0, 1, 1], [], []>} : vector<16x32xf32>, vector<32x32xf32>, vector<16x32xf32> -> vector<16x32xf32>
    %94 = vector.shape_cast %13 : vector<32xf32> to vector<1x32xf32>
    %95 = vector.broadcast %94 : vector<1x32xf32> to vector<16x32xf32>
    %96 = arith.addf %93, %95 : vector<16x32xf32>
    %97 = arith.addf %43, %96 : vector<16x32xf32>
    %98 = arith.addf %97, %61 : vector<16x32xf32>
    %cst_32 = arith.constant 0.000000e+00 : f32
    %99 = vector.broadcast %cst_32 : f32 to vector<16x32xf32>
    %100 = arith.maximumf %98, %99 : vector<16x32xf32>
    %cst_33 = arith.constant dense<0.000000e+00> : vector<16x64xf32>
    %101 = tpu.matmul %100, %6, %cst_33 {dimension_numbers = #tpu.dot_dimension_numbers<[1], [0], [0], [1], [0, 0, 1, 1], [], []>} : vector<16x32xf32>, vector<32x64xf32>, vector<16x64xf32> -> vector<16x64xf32>
    %102 = vector.extract_strided_slice %101 {offsets = [0, 0], sizes = [16, 32], strides = [1, 1]} : vector<16x64xf32> to vector<16x32xf32>
    %103 = vector.shape_cast %102 : vector<16x32xf32> to vector<2x8x32xf32>
    %104 = vector.extract_strided_slice %101 {offsets = [0, 32], sizes = [16, 32], strides = [1, 1]} : vector<16x64xf32> to vector<16x32xf32>
    %105 = vector.shape_cast %104 : vector<16x32xf32> to vector<2x8x32xf32>
    %cst_34 = arith.constant dense<0.000000e+00> : vector<2x32xf32>
    %106 = vector.multi_reduction <add>, %103, %cst_34 [1] : vector<2x8x32xf32> to vector<2x32xf32>
    %107 = vector.shape_cast %21 : vector<32xf32> to vector<1x32xf32>
    %108 = vector.broadcast %107 : vector<1x32xf32> to vector<2x32xf32>
    %109 = arith.addf %106, %108 : vector<2x32xf32>
    %110 = vector.shape_cast %23 : vector<32xf32> to vector<1x1x32xf32>
    %111 = vector.broadcast %110 : vector<1x1x32xf32> to vector<2x8x32xf32>
    %112 = arith.addf %105, %111 : vector<2x8x32xf32>
    %cst_35 = arith.constant 0.000000e+00 : f32
    %113 = vector.broadcast %cst_35 : f32 to vector<2x32xf32>
    %114 = arith.maximumf %109, %113 : vector<2x32xf32>
    %115 = vector.shape_cast %25 : vector<32xf32> to vector<1x32xf32>
    %116 = vector.broadcast %115 : vector<1x32xf32> to vector<2x32xf32>
    %117 = arith.mulf %114, %116 : vector<2x32xf32>
    %cst_36 = arith.constant dense<0.000000e+00> : vector<2xf32>
    %118 = vector.multi_reduction <add>, %117, %cst_36 [1] : vector<2x32xf32> to vector<2xf32>
    %119 = vector.shape_cast %118 : vector<2xf32> to vector<2x1xf32>
    %cst_37 = arith.constant 0.000000e+00 : f32
    %120 = vector.broadcast %cst_37 : f32 to vector<2x8x32xf32>
    %121 = arith.maximumf %112, %120 : vector<2x8x32xf32>
    %122 = vector.shape_cast %27 : vector<32xf32> to vector<1x1x32xf32>
    %123 = vector.broadcast %122 : vector<1x1x32xf32> to vector<2x8x32xf32>
    %124 = arith.mulf %121, %123 : vector<2x8x32xf32>
    %cst_38 = arith.constant dense<0.000000e+00> : vector<2x8xf32>
    %125 = vector.multi_reduction <add>, %124, %cst_38 [2] : vector<2x8x32xf32> to vector<2x8xf32>
    %126 = vector.broadcast %119 : vector<2x1xf32> to vector<2x8xf32>
    %127 = arith.addf %126, %125 : vector<2x8xf32>
    %c0_39 = arith.constant 0 : index
    %c0_40 = arith.constant 0 : index
    %128 = vector.load %arg6[%c0_39, %c0_40] : memref<1x1xf32, #tpu.memory_space<vmem>>, vector<1x1xf32>
    %129 = vector.broadcast %128 : vector<1x1xf32> to vector<2x8xf32>
    %130 = arith.addf %127, %129 : vector<2x8xf32>
    %c0_41 = arith.constant 0 : index
    %c0_42 = arith.constant 0 : index
    %c0_43 = arith.constant 0 : index
    %131 = vector.load %arg7[%c0_41, %c0_42, %c0_43] : memref<1x2x8xf32, #tpu.memory_space<vmem>>, vector<1x2x8xf32>
    %132 = vector.shape_cast %131 : vector<1x2x8xf32> to vector<2x8xf32>
    %133 = vector.shape_cast %130 : vector<2x8xf32> to vector<1x2x8xf32>
    tpu.vector_store %arg7[%c0_41, %c0_42, %c0_43], %133 {strides = array<i32>} : memref<1x2x8xf32, #tpu.memory_space<vmem>>, vector<1x2x8xf32>,
    return
  }
  func.func @transform_0(%arg0: i32) -> (i32, i32, i32) {
    %c0_i32 = arith.constant 0 : i32
    %c0_i32_0 = arith.constant 0 : i32
    %c0_i32_1 = arith.constant 0 : i32
    return %arg0, %c0_i32, %c0_i32_0 : i32, i32, i32
  }
  func.func @transform_1(%arg0: i32) -> (i32, i32, i32) {
    %c0_i32 = arith.constant 0 : i32
    %c0_i32_0 = arith.constant 0 : i32
    %c0_i32_1 = arith.constant 0 : i32
    return %arg0, %c0_i32, %c0_i32_0 : i32, i32, i32
  }
  func.func @transform_2(%arg0: i32) -> (i32, i32) {
    %c0_i32 = arith.constant 0 : i32
    %c0_i32_0 = arith.constant 0 : i32
    %c0_i32_1 = arith.constant 0 : i32
    return %c0_i32, %c0_i32_0 : i32, i32
  }
  func.func @transform_3(%arg0: i32) -> (i32, i32) {
    %c0_i32 = arith.constant 0 : i32
    %c0_i32_0 = arith.constant 0 : i32
    %c0_i32_1 = arith.constant 0 : i32
    return %c0_i32, %c0_i32_0 : i32, i32
  }
  func.func @transform_4(%arg0: i32) -> (i32, i32) {
    %c0_i32 = arith.constant 0 : i32
    %c0_i32_0 = arith.constant 0 : i32
    %c0_i32_1 = arith.constant 0 : i32
    return %c0_i32, %c0_i32_0 : i32, i32
  }
  func.func @transform_5(%arg0: i32) -> (i32, i32) {
    %c0_i32 = arith.constant 0 : i32
    %c0_i32_0 = arith.constant 0 : i32
    %c0_i32_1 = arith.constant 0 : i32
    return %c0_i32, %c0_i32_0 : i32, i32
  }
  func.func @transform_6(%arg0: i32) -> (i32, i32, i32) {
    %c0_i32 = arith.constant 0 : i32
    %c0_i32_0 = arith.constant 0 : i32
    %c0_i32_1 = arith.constant 0 : i32
    return %arg0, %c0_i32, %c0_i32_0 : i32, i32, i32
  }
}

</mosaic_0001>

<bundles_post_ra>
// kernel: qnet_forward.1
= control target key start
LH: loop header
LB: loop body
LE: loop exit
PB: predicated region body
PF: predicated region fallthrough
CT: control target
= control target key end

     0   :  { %s1619_s0 = inlined_call_operand.vmem [shape: f32[4,8,5], index: 0, kind: input, shape index: {}]   ;;  %s1620_s1 = inlined_call_operand.vmem [shape: f32[4,8,8], index: 1, kind: input, shape index: {}]   ;;  %s1621_s2 = inlined_call_operand.vmem [shape: f32[5,32], index: 2, kind: input, shape index: {}]   ;;  %s1622_s3 = inlined_call_operand.vmem [shape: f32[32,160], index: 3, kind: input, shape index: {}]   ;;  %s1623_s4 = inlined_call_operand.vmem [shape: f32[10,32], index: 4, kind: input, shape index: {}]   ;;  %s1624_s5 = inlined_call_operand.<no memory space> [shape: f32[1,1], index: 5, kind: input, shape index: {}]   ;;  %s1625_s6 = inlined_call_operand.hbm [shape: f32[2,2,8], index: 6, kind: output, shape index: {}]  }
   0x1   :  { %v11_v0 = vstv %s1624_s5 }
   0x2   :  { %12 = vst [vmem:[#allocation2] sm:$0x1] %v11_v0 }
   0x3   :  { %13 = vsyncpa [#allocation4], 0 }
   0x4   :  { %15 = vsyncpa [#allocation4 + $0x1], 0  ;;  %s1311_s23 = smov 0   ;;  %s1313_s24 = smov 0  }
   0x5   :  { %s1315_s25 = smov 0   ;;  %s1317_s26 = smov 0  }
   0x6 LB: > { %s1078_s5 = sadd.s32 4294967295, %s1266_s26   ;;  %s1079_s27 = sadd.s32 4294967294, %s1266_s26   ;;  %s1266_s26 = sphi %s1317_s26, %s1631_s26   ;;  %s1262_s25 = sphi %s1315_s25, %s1630_s25   ;;  %s1258_s24 = sphi %s1313_s24, %s1629_s24   ;;  %s1254_s23 = sphi %s1311_s23, %s1628_s23  }
   0x7   : > { %s1334_s28 = sadd.s32 1, %s1266_s26   ;;  %s164_s29 = sadd.s32 1, %s1262_s25 }
   0x8   : > { %s161_s30 = ssub.s32 %s1266_s26, %s1334_s28  ;;  %p174_p0 = scmp.ne.s32.totalorder %s1262_s25, %s1258_s24 }
   0x9   : > { %p162_p1 = scmp.eq.s32.totalorder %s161_s30, 0  ;;  %p175_p2 = scmp.eq.s32.totalorder %s1078_s5, 1 }
   0xa   : > { %p180_p3 = scmp.ne.s32.totalorder %s1258_s24, %s1254_s23  ;;  %p181_p4 = scmp.eq.s32.totalorder %s1079_s27, 1 }
   0xb   : > { %s1344_s7 = scalar_select %p162_p1, %s1262_s25, %s164_s29  }
   0xc   : > { %p1346_p5 = por %p175_p2, %p174_p0  ;;  %p1350_p6 = por %p181_p4, %p180_p3 }
   0xd   : > { %p1082_p7 = scmp.ge.s32.totalorder %s1266_s26, 1  ;;  %p229_p8 = scmp.lt.s32.totalorder %s1266_s26, 3 }
   0xf   : > { %p230_p9 = pnand %p1082_p7, %p229_p8 }
  0x10   : > { %s1356_s10 = sshll.u32 (!%p230_p9), %s1078_s5, 1  ;;  %s1268_s13 = smov (!%p230_p9), 64  }
  0x11   : > { %233 = sbr.rel (%p230_p9) target bundleno = 1518 (0x5ee), region = 44  ;;  %p265_p10 = scmp.lt.s32.totalorder (!%p230_p9), %s1356_s10, 3 }
  0x12   : > { %s1269_s16 = smov (!%p230_p9), 96   ;;  %s1271_s19 = smov (!%p230_p9), 32  }
  0x13   : > { %s261_s12 = sand.u32 (!%p230_p9), 1, %s1258_s24  }
  0x14   : > { %s993_s20 = scalar_lea.sflag (!%p230_p9), [#allocation4], %s261_s12 }
  0x16   : > { %v364_v1 = vlaneseq  ;;  %v280_v2 = vld [vmem:[%s1621_s2] sm:$0x1f]  ;;  %vm303_vm0 = vcmask 1044480   ;;  %v1366_v4 = vld [vmem:[%s1622_s3 + $0x30] sm:$0xff]  ;;  %s266_s15 = scalar_select %p265_p10, %s1356_s10, 3  ;;  %vm296_vm1 = vcmask 39936  }
  0x17   : > { %1088 = vmatpush.msk.msra.mxu0 %vm303_vm0, %v280_v2  ;;  %1113 = vmatpush.msk.msra.mxu1 %vm303_vm0, %v280_v2  ;;  %v1373_v5 = vld [vmem:[%s1622_s3 + $0x20] sm:$0xff]  ;;  %v1385_v6 = vld [vmem:[%s1622_s3 + $0x10] sm:$0xff]  ;;  %vm333_vm2 = vcmask 261120   ;;  %vm610_vm4 = vcmask 64512   ;;  %vm943_vm6 = vcmask 1041409   ;;  %vm946_vm7 = vcmask 254976  }
  0x18   : > { %v365_v3 = vshrl.u32 %v364_v1, 7  ;;  %s1085_s18 = sshll.u32 %s266_s15, 3  ;;  %v1396_v11 = vld [vmem:[%s1622_s3] sm:$0xff]  ;;  %v1406_v17 = vpack.i.bf16 %v1373_v5, %v1366_v4  ;;  %vm990_vm8 = vcmask 58368  }
  0x19   : > { %352 = vmatpush.msrb.mxu1 %v1366_v4  ;;  %s274_s21 = scalar_lea.vmem %s1620_s1, %s1085_s18  ;;  %s268_s27 = scalar_lea.vmem %s1619_s0, %s1085_s18  ;;  %v1417_v23 = vpack.i.bf16 %v1396_v11, %v1385_v6  ;;  %v1429_v35 = vld [vmem:[%s1623_s4] sm:$0xff] }
  0x1a   : > { %1160 = vset.pattern.permute.xlu2 %v365_v3  ;;  %1159 = vset.pattern.permute.xlu1 %v365_v3  ;;  %v1387_v7 = vld [vmem:[%s274_s21] sm:$0xff]  ;;  %v277_v16 = vld [vmem:[%s268_s27 + $0x8] sm:$0xff]  ;;  %v1432_v36 = vperm.slane %v1429_v35, 4  ;;  %v1435_v39 = vperm.slane %v1429_v35, 5  ;;  %v295_v41 = vperm.slane %v1429_v35, 0 }
  0x1b   : > { %1158 = vset.pattern.permute.xlu0 %v365_v3  ;;  %353 = vmatpush.msrb.mxu1 %v1373_v5  ;;  %v276_v8 = vld [vmem:[%s268_s27] sm:$0xff]  ;;  %v391_v9 = vperm.slane %v1387_v7, 4  ;;  %v377_v10 = vperm.slane %v1387_v7, 2  ;;  %v363_v12 = vperm.slane %v1387_v7, 0  ;;  %v398_v13 = vperm.slane %v1387_v7, 5  ;;  %v1411_v20 = vld [vmem:[%s274_s21 + $0x8] sm:$0xff] }
  0x1c   : > { %1089 = vmatmul.msk.f32.vlgmr.msra.gmra.mxu0 %vm296_vm1, %v276_v8  ;;  %v384_v14 = vperm.slane %v1387_v7, 3  ;;  %v370_v15 = vperm.slane %v1387_v7, 1  ;;  %1090 = vmatmul.msk.f32.vlgmr.msra.gmra.mxu1 %vm296_vm1, %v277_v16  ;;  %v412_v18 = vperm.slane %v1387_v7, 7  ;;  %v405_v19 = vperm.slane %v1387_v7, 6  ;;  %s1224_s27 = scalar_lea.hbm %s1625_s6, 4 }
  0x1d   : > { %354 = vmatpush.msrb.mxu1 %v1385_v6  ;;  %v426_v21 = vperm.slane %v1411_v20, 1  ;;  %v419_v22 = vperm.slane %v1411_v20, 0  ;;  %v447_v24 = vperm.slane %v1411_v20, 4  ;;  %v440_v25 = vperm.slane %v1411_v20, 3 }
  0x1e   : > { %v433_v26 = vperm.slane %v1411_v20, 2  ;;  %v468_v27 = vperm.slane %v1411_v20, 7  ;;  %v461_v28 = vperm.slane %v1411_v20, 6  ;;  %v454_v29 = vperm.slane %v1411_v20, 5 }
  0x1f   : > { %355 = vmatpush.msrb.mxu1 %v1396_v11  ;;  %vm291_vm3 = vcmp.gt.f32.partialorder %v1387_v7, 0.0  ;;  %vm292_vm5 = vcmp.gt.f32.partialorder %v1411_v20, 0.0 }
  0x22   : > { %396 = vperm.xlu2 %1160, %v391_v9   ;;  %382 = vperm.xlu1 %1159, %v377_v10  }
  0x23   : > { %368 = vperm.xlu0 %1158, %v363_v12  }
  0x2a   : > { %403 = vperm.xlu2 %1160, %v398_v13   ;;  %389 = vperm.xlu1 %1159, %v384_v14  }
  0x2b   : > { %375 = vperm.xlu0 %1158, %v370_v15  }
  0x32   : > { %1162 = vrot.lane.b32.xlu2 %v1406_v17, %s1268_s13  ;;  %417 = vperm.xlu1 %1159, %v412_v18  }
  0x33   : > { %410 = vperm.xlu0 %1158, %v405_v19  }
  0x3a   : > { %431 = vperm.xlu2 %1160, %v426_v21   ;;  %424 = vperm.xlu1 %1159, %v419_v22  }
  0x3b   : > { %1167 = vrot.lane.b32.xlu0 %v1417_v23, %s1268_s13  ;;  %s1083_s13 = sshll.u32 %s261_s12, 1 }
  0x3c   : > { %s263_s17 = scalar_lea.vmem [#allocation3], %s1083_s13 }
  0x3d   : > { %s1005_s18 = sshll.u32 %s263_s17, 4  ;;  %s1006_s18 = int_to_ptr.vmem [resolvable:$true] %s1005_s18 }
  0x42   : > { %452 = vperm.xlu2 %1160, %v447_v24   ;;  %445 = vperm.xlu1 %1159, %v440_v25  }
  0x43   : > { %438 = vperm.xlu0 %1158, %v433_v26  }
  0x4a   : > { %473 = vperm.xlu2 %1160, %v468_v27   ;;  %466 = vperm.xlu1 %1159, %v461_v28  }
  0x4b   : > { %459 = vperm.xlu0 %1158, %v454_v29  }
  0x52   : > { %1177 = vrot.lane.b32.xlu1 %v1417_v23, %s1269_s16 }
  0x53   : > { %1172 = vrot.lane.b32.xlu0 %v1406_v17, %s1269_s16 }
  0x7c   : > { %v397_v30 = vpop.permute.xlu2 %396 }
  0x7d   : > { %v480_v49 = vmul.f32 %v1432_v36, %v397_v30 }
  0x7f   : > { %v497_v57 = vadd.f32 %v1435_v39, %v480_v49 }
  0x81   : > { %v513_v10 = vmax.f32 %v497_v57, 0.0 }
  0x83   : > { %v532_v22 = vsel %vm333_vm2, %v513_v10, 0.0 }
  0x84   : > { %v404_v31 = vpop.permute.xlu2 %403 }
  0x85   : > { %v481_v53 = vmul.f32 %v1432_v36, %v404_v31 }
  0x87   : > { %v498_v60 = vadd.f32 %v1435_v39, %v481_v53 }
  0x89   : > { %v514_v15 = vmax.f32 %v498_v60, 0.0 }
  0x8b   : > { %v534_v27 = vsel %vm333_vm2, %v514_v15, 0.0 }
  0x8c   : > { %v1163_v32 = vpop.permute.xlu2 %1162 }
  0x8d   : > { %v1164_v33 = vunpack.i.l.bf16 %v1163_v32  ;;  %v1165_v34 = vunpack.i.h.bf16 %v1163_v32 }
  0x8f   : > { %592 = vmatpush.msra.mxu2 %v1164_v33 }
  0x91   : > { %593 = vmatpush.msra.mxu2 %v1165_v34 }
  0x94   : > { %v383_v37 = vpop.permute.xlu1 %382  ;;  %v432_v2 = vpop.permute.xlu2 %431 }
  0x95   : > { %v369_v38 = vpop.permute.xlu0 %368  ;;  %v478_v42 = vmul.f32 %v1432_v36, %v383_v37  ;;  %v485_v34 = vmul.f32 %v1432_v36, %v432_v2 }
  0x96   : > { %v476_v40 = vmul.f32 %v1432_v36, %v369_v38 }
  0x97   : > { %v495_v50 = vadd.f32 %v1435_v39, %v478_v42 }
  0x98   : > { %v493_v44 = vadd.f32 %v1435_v39, %v476_v40 }
  0x99   : > { %v324_v43 = vpop.f32.mrf.mxu0  ;;  %v511_v58 = vmax.f32 %v495_v50, 0.0  ;;  %v327_v26 = vpop.f32.mrf.mxu1 }
  0x9a   : > { %v325_v46 = vadd.f32 %v324_v43, %v295_v41  ;;  %v509_v54 = vmax.f32 %v493_v44, 0.0  ;;  %v328_v30 = vadd.f32 %v327_v26, %v295_v41 }
  0x9b   : > { %v528_v12 = vsel %vm333_vm2, %v511_v58, 0.0 }
  0x9c   : > { %v390_v45 = vpop.permute.xlu1 %389  ;;  %v330_v52 = vmax.f32 %v325_v46, 0.0  ;;  %v525_v61 = vsel %vm333_vm2, %v509_v54, 0.0  ;;  %v331_v40 = vmax.f32 %v328_v30, 0.0  ;;  %v453_v42 = vpop.permute.xlu2 %452 }
  0x9d   : > { %v479_v47 = vmul.f32 %v1432_v36, %v390_v45  ;;  %v376_v48 = vpop.permute.xlu0 %375  ;;  %v488_v53 = vmul.f32 %v1432_v36, %v453_v42 }
  0x9e   : > { %v477_v51 = vmul.f32 %v1432_v36, %v376_v48  ;;  %1091 = vmatmul.msk.f32.vlgmr.msrb.gmra.mxu1 %vm333_vm2, %v330_v52 }
  0x9f   : > { %v496_v55 = vadd.f32 %v1435_v39, %v479_v47  ;;  %v502_v47 = vadd.f32 %v1435_v39, %v485_v34  ;;  %v505_v60 = vadd.f32 %v1435_v39, %v488_v53 }
  0xa0   : > { %v494_v56 = vadd.f32 %v1435_v39, %v477_v51 }
  0xa1   : > { %v512_v62 = vmax.f32 %v496_v55, 0.0  ;;  %v518_v52 = vmax.f32 %v502_v47, 0.0 }
  0xa2   : > { %v510_v59 = vmax.f32 %v494_v56, 0.0 }
  0xa3   : > { %v530_v16 = vsel %vm333_vm2, %v512_v62, 0.0 }
  0xa4   : > { %v526_v63 = vsel %vm333_vm2, %v510_v59, 0.0  ;;  %v418_v0 = vpop.permute.xlu1 %417  ;;  %v474_v58 = vpop.permute.xlu2 %473  ;;  %v541_v59 = vsel %vm333_vm2, %v518_v52, 0.0 }
  0xa5   : > { %v527_v3 = vadd.f32 %v526_v63, %v525_v61  ;;  %v483_v8 = vmul.f32 %v1432_v36, %v418_v0  ;;  %v411_v9 = vpop.permute.xlu0 %410  ;;  %v491_v0 = vmul.f32 %v1432_v36, %v474_v58 }
  0xa6   : > { %v482_v13 = vmul.f32 %v1432_v36, %v411_v9  ;;  %1092 = vmatmul.msk.f32.gmra.mxu1 %vm333_vm2, %v331_v40  ;;  %v1501_v40 = vperm.slane %v1429_v35, 2 }
  0xa7   : > { %v529_v14 = vadd.f32 %v528_v12, %v527_v3  ;;  %v500_v18 = vadd.f32 %v1435_v39, %v483_v8  ;;  %v521_v12 = vmax.f32 %v505_v60, 0.0 }
  0xa8   : > { %v499_v19 = vadd.f32 %v1435_v39, %v482_v13 }
  0xa9   : > { %v531_v21 = vadd.f32 %v530_v16, %v529_v14  ;;  %v516_v28 = vmax.f32 %v500_v18, 0.0  ;;  %v508_v18 = vadd.f32 %v1435_v39, %v491_v0 }
  0xaa   : > { %v515_v24 = vmax.f32 %v499_v19, 0.0 }
  0xab   : > { %v533_v25 = vadd.f32 %v532_v22, %v531_v21  ;;  %v538_v46 = vsel %vm333_vm2, %v516_v28, 0.0  ;;  %v547_v21 = vsel %vm333_vm2, %v521_v12, 0.0  ;;  %v524_v26 = vmax.f32 %v508_v18, 0.0 }
  0xac   : > { %v425_v29 = vpop.permute.xlu1 %424  ;;  %v536_v37 = vsel %vm333_vm2, %v515_v24, 0.0 }
  0xad   : > { %v484_v31 = vmul.f32 %v1432_v36, %v425_v29  ;;  %v1168_v32 = vpop.permute.xlu0 %1167  ;;  %v535_v33 = vadd.f32 %v534_v27, %v533_v25 }
  0xae   : > { %v1169_v38 = vunpack.i.l.bf16 %v1168_v32  ;;  %v1170_v45 = vunpack.i.h.bf16 %v1168_v32 }
  0xaf   : > { %v537_v43 = vadd.f32 %v536_v37, %v535_v33  ;;  %v501_v44 = vadd.f32 %v1435_v39, %v484_v31  ;;  %v557_v33 = vperm.slane %v1429_v35, 3 }
  0xb0   : > { %594 = vmatpush.msra.mxu2 %v1169_v38 }
  0xb1   : > { %v539_v41 = vadd.f32 %v538_v46, %v537_v43  ;;  %v517_v48 = vmax.f32 %v501_v44, 0.0  ;;  %v1270_v43 = vmov 0.0  }
  0xb2   : > { %595 = vmatpush.msra.mxu2 %v1170_v45  ;;  %v293_v44 = vsel %vm291_vm3, 1.0, %v1270_v43 }
  0xb3   : > { %1093 = vmatmul.msk.f32.vlgmr.msra.gmra.mxu2 %vm333_vm2, %v539_v41  ;;  %v540_v56 = vsel %vm333_vm2, %v517_v48, 0.0 }
  0xb4   : > { %v446_v49 = vpop.permute.xlu1 %445  ;;  %v542_v63 = vadd.f32 %v541_v59, %v540_v56 }
  0xb5   : > { %v487_v50 = vmul.f32 %v1432_v36, %v446_v49  ;;  %v439_v51 = vpop.permute.xlu0 %438 }
  0xb6   : > { %v486_v54 = vmul.f32 %v1432_v36, %v439_v51 }
  0xb7   : > { %v504_v55 = vadd.f32 %v1435_v39, %v487_v50  ;;  %v294_v50 = vsel %vm292_vm5, 1.0, %v1270_v43 }
  0xb8   : > { %v503_v57 = vadd.f32 %v1435_v39, %v486_v54 }
  0xb9   : > { %v520_v61 = vmax.f32 %v504_v55, 0.0 }
  0xba   : > { %v519_v62 = vmax.f32 %v503_v57, 0.0 }
  0xbb   : > { %v545_v13 = vsel %vm333_vm2, %v520_v61, 0.0 }
  0xbc   : > { %v543_v2 = vsel %vm333_vm2, %v519_v62, 0.0  ;;  %v467_v3 = vpop.permute.xlu1 %466 }
  0xbd   : > { %v544_v8 = vadd.f32 %v543_v2, %v542_v63  ;;  %v490_v9 = vmul.f32 %v1432_v36, %v467_v3  ;;  %v460_v10 = vpop.permute.xlu0 %459 }
  0xbe   : > { %v489_v14 = vmul.f32 %v1432_v36, %v460_v10  ;;  %v553_v36 = vsel %vm333_vm2, %v524_v26, 0.0 }
  0xbf   : > { %v546_v15 = vadd.f32 %v545_v13, %v544_v8  ;;  %v507_v16 = vadd.f32 %v1435_v39, %v490_v9 }
  0xc0   : > { %v506_v19 = vadd.f32 %v1435_v39, %v489_v14  ;;  %v332_v39 = vperm.slane %v1429_v35, 1 }
  0xc1   : > { %v523_v22 = vmax.f32 %v507_v16, 0.0  ;;  %v548_v25 = vadd.f32 %v547_v21, %v546_v15 }
  0xc2   : > { %v522_v24 = vmax.f32 %v506_v19, 0.0 }
  0xc3   : > { %v551_v29 = vsel %vm333_vm2, %v523_v22, 0.0 }
  0xc4   : > { %v549_v27 = vsel %vm333_vm2, %v522_v24, 0.0  ;;  %v1178_v52 = vpop.permute.xlu1 %1177 }
  0xc5   : > { %v550_v28 = vadd.f32 %v549_v27, %v548_v25  ;;  %v1173_v51 = vpop.permute.xlu0 %1172  ;;  %v1179_v55 = vunpack.i.l.bf16 %v1178_v52  ;;  %v1180_v56 = vunpack.i.h.bf16 %v1178_v52  ;;  %v287_v25 = vld [vmem:[%s1622_s3 + $0x28] sm:$0xff]  ;;  %v286_v27 = vld [vmem:[%s1622_s3 + $0x18] sm:$0xff] }
  0xc6   : > { %v1175_v53 = vunpack.i.h.bf16 %v1173_v51  ;;  %v1174_v54 = vunpack.i.l.bf16 %v1173_v51  ;;  %v1186_v26 = vpack.i.bf16 %v287_v25, %v1373_v5  ;;  %v285_v5 = vld [vmem:[%s1622_s3 + $0x8] sm:$0xff] }
  0xc7   : > { %v552_v30 = vadd.f32 %v551_v29, %v550_v28  ;;  %v1191_v28 = vpack.i.bf16 %v286_v27, %v1385_v6  ;;  %v288_v29 = vld [vmem:[%s1622_s3 + $0x38] sm:$0xff]  ;;  %v290_v51 = vld [vmem:[%s1623_s4 + $0x8] sm:$0x3] }
  0xc8   : > { %687 = vmatpush.msrb.mxu0 %v1174_v54  ;;  %1187 = vrot.lane.b32.xlu0 %v1186_v26, %s1271_s19  ;;  %v952_v52 = vperm.slane %v290_v51, 1 }
  0xc9   : > { %v554_v31 = vadd.f32 %v553_v36, %v552_v30  ;;  %1192 = vrot.lane.b32.xlu1 %v1191_v28, %s1271_s19  ;;  %v1181_v30 = vpack.i.bf16 %v288_v29, %v1366_v4  ;;  %v1196_v36 = vpack.i.bf16 %v285_v5, %v1396_v11  ;;  %v937_v29 = vperm.slane %v290_v51, 0 }
  0xca   : > { %688 = vmatpush.msrb.mxu0 %v1175_v53 }
  0xcb   : > { %1094 = vmatmul.msk.f32.gmra.mxu2 %vm333_vm2, %v554_v31  ;;  %1182 = vrot.lane.b32.xlu2 %v1181_v30, %s1271_s19 }
  0xcc   : > { %689 = vmatpush.msrb.mxu0 %v1179_v55 }
  0xce   : > { %690 = vmatpush.msrb.mxu0 %v1180_v56 }
  0xd0   : > { %837 = vmatpush.msra.mxu0 %v1174_v54 }
  0xd1   : > { %954 = vrot.lane.b32.xlu1 %v952_v52, %s1271_s19 }
  0xd2   : > { %838 = vmatpush.msra.mxu0 %v1175_v53 }
  0xd3   : > { %1197 = vrot.lane.b32.xlu2 %v1196_v36, %s1271_s19 }
  0xd4   : > { %839 = vmatpush.msra.mxu0 %v1179_v55 }
  0xd6   : > { %840 = vmatpush.msra.mxu0 %v1180_v56 }
 0x11b   : > { %v357_v32 = vpop.f32.mrf.mxu1 }
 0x11c   : > { %v1496_v34 = vadd.f32 %v357_v32, %v332_v39 }
 0x123   : > { %v360_v45 = vpop.f32.mrf.mxu1 }
 0x124   : > { %v1508_v46 = vadd.f32 %v360_v45, %v332_v39 }
 0x125   : > { %v1183_v39 = vpop.permute.xlu2 %1182 }
 0x126   : > { %v1184_v4 = vunpack.i.l.bf16 %v1183_v39 }
 0x12d   : > { %v1198_v45 = vpop.permute.xlu2 %1197 }
 0x136   : > { %v597_v37 = vpop.f32.mrf.mxu2 }
 0x137   : > { %v1498_v38 = vadd.f32 %v597_v37, %v557_v33 }
 0x139   : > { %v603_v42 = vadd.f32 %v1498_v38, %v1496_v34 }
 0x13a   : > { %v1188_v32 = vpop.permute.xlu0 %1187 }
 0x13b   : > { %v606_v17 = vadd.f32 %v1501_v40, %v603_v42  ;;  %v1190_v37 = vunpack.i.h.bf16 %v1188_v32  ;;  %v1189_v42 = vunpack.i.l.bf16 %v1188_v32 }
 0x13d   : > { %v608_v23 = vmax.f32 %v606_v17, 0.0 }
 0x13f   : > { %629 = vmatpush.msrb.mxu2 %v608_v23  ;;  %v1193_v23 = vpop.permute.xlu1 %1192 }
 0x140   : > { %1095 = vmatmul.msk.f32.vlgmr.msrb.gmra.mxu2 %vm610_vm4, %v293_v44  ;;  %v1195_v43 = vunpack.i.h.bf16 %v1193_v23  ;;  %v1194_v11 = vunpack.i.l.bf16 %v1193_v23 }
 0x141   : > { %762 = vmatpush.msra.mxu2 %v1174_v54 }
 0x143   : > { %763 = vmatpush.msra.mxu2 %v1175_v53 }
 0x145   : > { %764 = vmatpush.msra.mxu2 %v1179_v55 }
 0x147   : > { %765 = vmatpush.msra.mxu2 %v1180_v56 }
 0x14e   : > { %v600_v41 = vpop.f32.mrf.mxu2 }
 0x14f   : > { %v1510_v47 = vadd.f32 %v600_v41, %v557_v33  ;;  %v1185_v33 = vunpack.i.h.bf16 %v1183_v39  ;;  %v1200_v41 = vunpack.i.h.bf16 %v1198_v45 }
 0x151   : > { %v604_v48 = vadd.f32 %v1510_v47, %v1508_v46  ;;  %v877_v17 = vsel %vm333_vm2, %v1184_v4, %v1185_v33  ;;  %v1203_v4 = vld [vmem:[#allocation2] ss:$0 sm:$0xff] }
 0x153   : > { %v607_v7 = vadd.f32 %v1501_v40, %v604_v48  ;;  %v1199_v48 = vunpack.i.l.bf16 %v1198_v45 }
 0x155   : > { %v609_v49 = vmax.f32 %v607_v7, 0.0  ;;  %v875_v7 = vsel %vm333_vm2, %v1194_v11, %v1195_v43  ;;  %v976_v43 = vand.u32 127, %v364_v1 }
 0x157   : > { %652 = vmatpush.msra.mxu3 %v609_v49  ;;  %v874_v49 = vsel %vm333_vm2, %v1199_v48, %v1200_v41 }
 0x158   : > { %1096 = vmatmul.msk.f32.vlgmr.msra.gmra.mxu3 %vm610_vm4, %v294_v50 }
 0x1c3   : > { %v631_v20 = vpop.f32.mrf.mxu2 }
 0x1c4   : > { %1097 = vmatmul.msk.f32.vlgmr.msrb.gmra.mxu0 %vm333_vm2, %v631_v20 }
 0x1db   : > { %v654_v57 = vpop.f32.mrf.mxu3 }
 0x1dc   : > { %1098 = vmatmul.msk.f32.gmra.mxu0 %vm333_vm2, %v654_v57 }
 0x241   : > { %v692_v58 = vpop.f32.mrf.mxu0 }
 0x242   : > { %v693_v59 = vadd.f32 %v692_v58, %v1501_v40 }
 0x244   : > { %v698_v60 = vadd.f32 %v693_v59, %v1496_v34 }
 0x246   : > { %v700_v61 = vadd.f32 %v698_v60, %v1498_v38 }
 0x248   : > { %v702_v62 = vmax.f32 %v700_v61, 0.0 }
 0x24a   : > { %719 = vmatpush.msrb.mxu3 %v702_v62 }
 0x24b   : > { %1099 = vmatmul.msk.f32.vlgmr.msrb.gmra.mxu3 %vm610_vm4, %v293_v44 }
 0x259   : > { %v695_v63 = vpop.f32.mrf.mxu0 }
 0x25a   : > { %v696_v0 = vadd.f32 %v695_v63, %v1501_v40 }
 0x25c   : > { %v699_v2 = vadd.f32 %v696_v0, %v1508_v46 }
 0x25e   : > { %v701_v3 = vadd.f32 %v699_v2, %v1510_v47 }
 0x260   : > { %v703_v8 = vmax.f32 %v701_v3, 0.0 }
 0x262   : > { %739 = vmatpush.msra.mxu1 %v703_v8 }
 0x263   : > { %1100 = vmatmul.msk.f32.vlgmr.msra.gmra.mxu1 %vm610_vm4, %v294_v50 }
 0x2ce   : > { %v721_v9 = vpop.f32.mrf.mxu3 }
 0x2cf   : > { %1101 = vmatmul.msk.f32.vlgmr.msra.gmra.mxu2 %vm333_vm2, %v721_v9 }
 0x2e0   : > { %v741_v10 = vpop.f32.mrf.mxu1 }
 0x2e1   : > { %1102 = vmatmul.msk.f32.gmra.mxu2 %vm333_vm2, %v741_v10 }
 0x352   : > { %v767_v12 = vpop.f32.mrf.mxu2 }
 0x353   : > { %v768_v13 = vadd.f32 %v767_v12, %v1501_v40 }
 0x355   : > { %v773_v14 = vadd.f32 %v768_v13, %v1496_v34 }
 0x357   : > { %v775_v15 = vadd.f32 %v773_v14, %v1498_v38 }
 0x359   : > { %v777_v16 = vmax.f32 %v775_v15, 0.0 }
 0x35b   : > { %794 = vmatpush.msra.mxu3 %v777_v16 }
 0x35c   : > { %1103 = vmatmul.msk.f32.vlgmr.msra.gmra.mxu3 %vm610_vm4, %v293_v44  ;;  %v876_v44 = vsel %vm333_vm2, %v1189_v42, %v1190_v37  ;;  %v1272_v37 = vmov 0  }
 0x35d   : > { %900 = vmatpush.msrb.mxu3 %v877_v17  ;;  %1201 = vset.pattern.permute.xlu2 %v1272_v37 }
 0x35e   : > { %1202 = vset.pattern.permute.xlu0 %v1272_v37 }
 0x35f   : > { %901 = vmatpush.msrb.mxu3 %v876_v44 }
 0x361   : > { %902 = vmatpush.msrb.mxu3 %v875_v7 }
 0x363   : > { %903 = vmatpush.msrb.mxu3 %v874_v49 }
 0x364   : > { %v770_v18 = vpop.f32.mrf.mxu2 }
 0x365   : > { %v771_v19 = vadd.f32 %v770_v18, %v1501_v40 }
 0x367   : > { %v774_v21 = vadd.f32 %v771_v19, %v1508_v46 }
 0x369   : > { %v776_v22 = vadd.f32 %v774_v21, %v1510_v47 }
 0x36b   : > { %v778_v24 = vmax.f32 %v776_v22, 0.0 }
 0x36d   : > { %814 = vmatpush.msrb.mxu1 %v778_v24  ;;  %v925_v24 = vperm.slane %v1429_v35, 6 }
 0x36e   : > { %1104 = vmatmul.msk.f32.vlgmr.msrb.gmra.mxu1 %vm610_vm4, %v294_v50  ;;  %v928_v50 = vperm.slane %v1429_v35, 7 }
 0x370   : > { %930 = vrot.lane.b32.xlu0 %v928_v50, %s1271_s19 }
 0x3df   : > { %v796_v31 = vpop.f32.mrf.mxu3 }
 0x3e0   : > { %1105 = vmatmul.msk.f32.vlgmr.msra.gmra.mxu0 %vm333_vm2, %v796_v31 }
 0x3e2   : > { %v931_v62 = vpop.permute.xlu0 %930 }
 0x3eb   : > { %v816_v6 = vpop.f32.mrf.mxu1 }
 0x3ec   : > { %1106 = vmatmul.msk.f32.gmra.mxu0 %vm333_vm2, %v816_v6 }
 0x45d   : > { %v842_v53 = vpop.f32.mrf.mxu0 }
 0x45e   : > { %v843_v54 = vadd.f32 %v842_v53, %v1501_v40 }
 0x460   : > { %v848_v55 = vadd.f32 %v843_v54, %v1496_v34 }
 0x462   : > { %v850_v56 = vadd.f32 %v848_v55, %v1498_v38  ;;  %v955_v38 = vpop.permute.xlu1 %954 }
 0x464   : > { %v852_v20 = vmax.f32 %v850_v56, 0.0 }
 0x466   : > { %1107 = vmatmul.msk.f32.vlgmr.msrb.gmra.mxu3 %vm333_vm2, %v852_v20 }
 0x469   : > { %v845_v57 = vpop.f32.mrf.mxu0 }
 0x46a   : > { %v846_v58 = vadd.f32 %v845_v57, %v1501_v40 }
 0x46c   : > { %v849_v59 = vadd.f32 %v846_v58, %v1508_v46 }
 0x46e   : > { %v851_v60 = vadd.f32 %v849_v59, %v1510_v47 }
 0x470   : > { %v853_v61 = vmax.f32 %v851_v60, 0.0 }
 0x472   : > { %1108 = vmatmul.msk.f32.gmra.mxu3 %vm333_vm2, %v853_v61 }
 0x4e9   : > { %v905_v63 = vpop.f32.mrf.mxu3 }
 0x4ea   : > { %v911_v0 = vsel %vm333_vm2, %v905_v63, 0.0  ;;  %v933_v34 = vadd.f32 %v931_v62, %v905_v63 }
 0x4eb   : > { %v912_v2 = vrot.slane %v911_v0, 4 }
 0x4ec   : > { %v950_v3 = vmax.f32 %v933_v34, 0.0 }
 0x4ed   : > { %v913_v8 = vadd.f32 %v912_v2, %v911_v0 }
 0x4ee   : > { %v957_v9 = vmul.f32 %v955_v38, %v950_v3 }
 0x4ef   : > { %v914_v40 = vrot.slane %v913_v8, 2 }
 0x4f0   : > { %961 = vrot.lane.b32.xlu2 %v957_v9, %s1269_s16 }
 0x4f1   : > { %v915_v10 = vadd.f32 %v914_v40, %v913_v8 }
 0x4f3   : > { %v916_v15 = vrot.slane %v915_v10, 1 }
 0x4f5   : > { %v908_v46 = vpop.f32.mrf.mxu3  ;;  %v917_v21 = vadd.f32 %v916_v15, %v915_v10 }
 0x4f6   : > { %v918_v47 = vsel %vm333_vm2, %v908_v46, 0.0  ;;  %v934_v12 = vadd.f32 %v931_v62, %v908_v46 }
 0x4f7   : > { %v919_v13 = vrot.slane %v918_v47, 4  ;;  %v926_v27 = vadd.f32 %v925_v24, %v917_v21 }
 0x4f8   : > { %v951_v14 = vmax.f32 %v934_v12, 0.0 }
 0x4f9   : > { %v920_v16 = vadd.f32 %v919_v13, %v918_v47  ;;  %v935_v5 = vmax.f32 %v926_v27, 0.0 }
 0x4fa   : > { %v958_v18 = vmul.f32 %v955_v38, %v951_v14 }
 0x4fb   : > { %v921_v19 = vrot.slane %v920_v16, 2  ;;  %v938_v31 = vmul.f32 %v937_v29, %v935_v5 }
 0x4fc   : > { %963 = vrot.lane.b32.xlu0 %v958_v18, %s1269_s16  ;;  %s1003_s16 = scalar_lea.hbm %s1625_s6, %s1356_s10 }
 0x4fd   : > { %v922_v22 = vadd.f32 %v921_v19, %v920_v16  ;;  %s1007_s19 = sshll.u32 %s1003_s16, 4  ;;  %s1008_s19 = int_to_ptr.hbm [resolvable:$true] %s1007_s19 }
 0x4fe   : > { %s1218_s21 = sshra.s32 %s1008_s19, 4  ;;  %s1219_s21 = int_to_ptr.hbm [resolvable:$true] %s1218_s21 }
 0x4ff   : > { %v923_v25 = vrot.slane %v922_v22, 1  ;;  %s1220_s10 = scalar_lea.hbm %s1219_s21, 2  ;;  %p1225_p0 = scmp.lt.s32.totalorder %s1219_s21, %s1625_s6 }
 0x500   : > { %p1221_p11 = scmp.ne.s32.totalorder %s1219_s21, %s1220_s10  ;;  %p1226_p1 = scmp.lt.s32.totalorder %s1224_s27, %s1220_s10 }
 0x501   : > { %v924_v26 = vadd.f32 %v923_v25, %v922_v22 }
 0x502   : > { %p1222_p12 = pnand %p1221_p11, %p1346_p5  ;;  %p1227_p2 = por %p1226_p1, %p1225_p0 }
 0x503   : > { %v927_v28 = vadd.f32 %v925_v24, %v924_v26 }
 0x504   : > { %p1223_p13 = pneg %p1222_p12 }
 0x505   : > { %v936_v30 = vmax.f32 %v927_v28, 0.0 }
 0x506   : > { %p1228_p3 = pnand %p1227_p2, %p1223_p13 }
 0x507   : > { %v939_v36 = vmul.f32 %v937_v29, %v936_v30 }
 0x509   : > { %v942_v6 = vrot.slane %v939_v36, 7 }
 0x50b   : > { %v944_v39 = vsel %vm943_vm6, %v942_v6, %v938_v31 }
 0x50c   : > { %v947_v32 = vsel %vm946_vm7, %v944_v39, 0.0 }
 0x50d   : > { %948 = vadd.xlane.f32.xlu1 %v947_v32 }
 0x54a   : > { %v962_v33 = vpop.permute.xlu2 %961 }
 0x54b   : > { %v967_v35 = vsel %vm333_vm2, %v962_v33, 0.0 }
 0x54c   : > { %968 = vadd.xlane.f32.xlu2 %v967_v35 }
 0x564   : > { %986 = vperm.xlu2 %1201, %v1203_v4  }
 0x56e   : > { %v964_v42 = vpop.permute.xlu0 %963 }
 0x56f   : > { %v970_v17 = vsel %vm333_vm2, %v964_v42, 0.0 }
 0x570   : > { %971 = vadd.xlane.f32.xlu0 %v970_v17 }
 0x580   : > { %v949_v41 = vpop.xlane.xlu1 %948 }
 0x5bf   : > { %v969_v23 = vpop.xlane.xlu2 %968 }
 0x5c0   : > { %v977_v44 = vperm.slane %v969_v23, %v976_v43 }
 0x5c7   : > { %v987_v48 = vpop.permute.xlu2 %986 }
 0x5e3   : > { %v972_v11 = vpop.xlane.xlu0 %971 }
 0x5e4   : > { %v978_v45 = vperm.slane %v972_v11, %v976_v43 }
 0x5e6   : > { %v979_v7 = vsel %vm943_vm6, %v978_v45, %v977_v44 }
 0x5e7   : > { %v981_v49 = vadd.f32 %v979_v7, %v949_v41 }
 0x5e9   : > { %v989_v50 = vadd.f32 %v987_v48, %v981_v49 }
 0x5eb   : > { %991 = vst.msk [vmem:[%s263_s17] sm:$0x3] %vm990_vm8, %v989_v50 }
 0x5ec   : > { %1231 = shalt.err (!%p1228_p3)
}
 0x5ed   : > { %1114 = dma.vmem_to_hbm [thread:$0]  (%p1346_p5), %s1006_s18, 32, %s1008_s19, %s993_s20  }
 0x5ee PF: > { %p1120_p4 = scmp.ge.s32.totalorder %s1266_s26, 2  ;;  %s1019_s11 = sand.u32 1, %s1254_s23  }
 0x5ef   : > { %s1020_s12 = scalar_lea.sflag [#allocation4], %s1019_s11 }
 0x5f0   : > { %p1117_p7 = pnand %p1120_p4, %p1350_p6 }
 0x5f2   : > { %p1118_p8 = pneg %p1117_p7 }
 0x5f4   : > { %1249 = dma.done.wait (%p1118_p8), %s1020_s12, 32  }
 0x5f5   : > { %1251 = vsyncadd (%p1118_p8), %s1020_s12, 4294967264  ;;  %p18_p9 = scmp.ge.s32.totalorder %s1334_s28, 4   ;;  %s1628_s23 = smov %s1258_s24 }
 0x5f6   : > { %s1629_s24 = smov %s1262_s25  ;;  %s1630_s25 = smov %s1344_s7 }
 0x5f7   : > { %s1631_s26 = smov %s1334_s28  ;;  %20 = sbr.rel (!%p18_p9) target bundleno = 6 (0x6), region = 82 }
 0x5fc   :  { %1026 = vsyncpa [#allocation4], 1 }
 0x5fd   :  { %1028 = vsyncpa [#allocation4 + $0x1], 1 }

</bundles_post_ra>
